<compile_context>
chip_gen: v7x
topology: tpu7x:2x2x1
jax: 0.10.0
libtpu: 0.0.40
codegen_flags: <defaults>
</compile_context>

<pallas_src>
import functools
import math

import jax
import jax.numpy as jnp
from jax.experimental import pallas as pl
from jax.experimental.pallas import tpu as pltpu

HIDDEN = 256
TB_MAX = 4096  # target rows per grid step (activations ~4 MiB f32 at this size)


def _round_up(x, m):
    return ((x + m - 1) // m) * m


def _cdiv(a, b):
    return -(-a // b)


def _device_kind():
    try:
        return jax.devices()[0].device_kind.lower()
    except Exception:  # pragma: no cover - defensive only
        return ""


# ----------------------------------------------------------------------------
# Kernel
# ----------------------------------------------------------------------------
def _critic_kernel(x_ref, w1, b1, w2, b2, w3, b3, w4, b4, w5, b5, o_ref, *,
                   vpu_tail):
    """Whole 5-layer MLP for one batch tile. Weights are VMEM-resident bf16."""
    h = x_ref[...]  # bf16 (TB, d_in)

    # Hidden layers: bf16 MXU matmul, f32 accumulate, f32 bias add, then the
    # ReLU on the bf16-packed activation (bit-exact with relu-then-cast and
    # half the VALU vregs).  The next dot consumes the bf16 directly.
    for w_ref, b_ref in ((w1, b1), (w2, b2), (w3, b3), (w4, b4)):
        acc = jnp.dot(h, w_ref[...], preferred_element_type=jnp.float32)
        acc = acc + b_ref[...]
        h = jnp.maximum(acc.astype(jnp.bfloat16), 0)

    if vpu_tail:
        # v5e only (MXU-bound chip): keep the N=1 tail off the MXU.
        # w5 is a (1, HIDDEN) row; VPU multiply + XLU lane reduction.
        o = jnp.sum(h.astype(jnp.float32) * w5[...].astype(jnp.float32),
                    axis=-1, keepdims=True) + b5[...]
    else:
        # v6e/v7x: MXU has slack, VALU does not -> plain MXU dot.
        o = jnp.dot(h, w5[...], preferred_element_type=jnp.float32) + b5[...]
    o_ref[...] = o.astype(o_ref.dtype)


# ----------------------------------------------------------------------------
# Parameters
# ----------------------------------------------------------------------------
def init_critic_params(key, d_input, d_output):
    """Deterministic init mirroring PyTorch nn.Linear default U(-1/sqrt(fan_in), +)."""
    dims = [d_input, HIDDEN, HIDDEN, HIDDEN, HIDDEN, d_output]
    params = {}
    for i in range(5):
        fan_in, fan_out = dims[i], dims[i + 1]
        k = 1.0 / math.sqrt(fan_in)
        key, kw, kb = jax.random.split(key, 3)
        # stored (in, out) so the kernel computes x @ W
        params[f"w{i+1}"] = jax.random.uniform(
            kw, (fan_in, fan_out), jnp.float32, -k, k)
        params[f"b{i+1}"] = jax.random.uniform(
            kb, (1, fan_out), jnp.float32, -k, k)
    return params


def prepare_critic_params(params, weight_dtype=jnp.bfloat16):
    """Cast weights to bf16, keep biases f32; also keep a row-layout copy of w5
    for the v5e VPU tail path when d_output == 1."""
    d_output = params["w5"].shape[1]
    prep = {}
    for i in (1, 2, 3, 4):
        prep[f"w{i}"] = params[f"w{i}"].astype(weight_dtype)
        prep[f"b{i}"] = params[f"b{i}"].astype(jnp.float32)
    prep["w5"] = params["w5"].astype(weight_dtype)           # (HIDDEN, d_output)
    prep["b5"] = params["b5"].astype(jnp.float32)
    if d_output == 1:
        prep["w5_row"] = params["w5"].reshape(1, HIDDEN).astype(weight_dtype)
    return prep


# ----------------------------------------------------------------------------
# Tiling
# ----------------------------------------------------------------------------
def _choose_tiling(B, *, is_v7):
    """G = number of grid steps, TB = rows per step (sublane-aligned)."""
    G = max(1, _cdiv(B, TB_MAX))
    if is_v7:
        # Give both TensorCores work once each core would get a decent tile,
        # and keep the step count even so the megacore split is balanced.
        if G == 1 and B >= 512:
            G = 2
        if G > 1 and G % 2 == 1:
            G += 1
    TB = _round_up(_cdiv(B, G), 8)
    return TB, G, G * TB


# ----------------------------------------------------------------------------
# Forward
# ----------------------------------------------------------------------------
def critic_forward(obs, action, prep):
    B = obs.shape[0]
    d_obs = obs.shape[1]
    d_act = action.shape[1]
    d_in = d_obs + d_act
    d_output = prep["w5"].shape[1]

    kind = _device_kind()
    is_v5 = "v5" in kind
    is_v7 = "v7" in kind

    TB, G, B_pad = _choose_tiling(B, is_v7=is_v7)

    # Pack [obs|action] once in the wrapper as bf16: one layer-1 dot in-kernel,
    # half the input DMA bytes, no per-step cast.
    x = jnp.concatenate([obs, action], axis=-1).astype(jnp.bfloat16)
    if B_pad != B:
        x = jnp.pad(x, ((0, B_pad - B), (0, 0)))

    vpu_tail = bool(is_v5 and d_output == 1 and "w5_row" in prep)
    w5 = prep["w5_row"] if vpu_tail else prep["w5"]

    weights = [prep["w1"], prep["b1"], prep["w2"], prep["b2"],
               prep["w3"], prep["b3"], prep["w4"], prep["b4"],
               w5, prep["b5"]]

    def resident_spec(shape):
        n = len(shape)
        return pl.BlockSpec(shape, lambda i, _n=n: (0,) * _n)   # constant -> no re-DMA

    in_specs = ([pl.BlockSpec((TB, d_in), lambda i: (i, 0))]
                + [resident_spec(w.shape) for w in weights])
    out_spec = pl.BlockSpec((TB, d_output), lambda i: (i, 0))

    weight_bytes = sum(int(w.size) * w.dtype.itemsize for w in weights)
    flops = 2 * B_pad * (d_in * HIDDEN + 3 * HIDDEN * HIDDEN + HIDDEN * d_output)
    bytes_accessed = (weight_bytes
                      + B_pad * d_in * 2          # bf16 inputs
                      + B_pad * d_output * 4)     # f32 outputs

    # VMEM budget as a function of TB: double-buffered IO + resident weights
    # (assume 2x) + a few live (TB, HIDDEN) f32/bf16 intermediates, with 2x headroom.
    est = (2 * weight_bytes
           + 2 * TB * d_in * 2
           + 2 * TB * d_output * 4
           + TB * HIDDEN * (3 * 4 + 2 * 2))
    vmem_limit = int(min(max(2 * est, 32 * 1024 * 1024), 48 * 1024 * 1024))

    kernel = functools.partial(_critic_kernel, vpu_tail=vpu_tail)

    out = pl.pallas_call(
        kernel,
        out_shape=jax.ShapeDtypeStruct((B_pad, d_output), jnp.float32),
        grid=(G,),
        in_specs=in_specs,
        out_specs=out_spec,
        compiler_params=pltpu.CompilerParams(
            dimension_semantics=("parallel",),
            vmem_limit_bytes=vmem_limit,
        ),
        cost_estimate=pl.CostEstimate(
            flops=flops, transcendentals=0, bytes_accessed=bytes_accessed),
    )(x, *weights)

    out = out[:B]
    # torch.squeeze(q, -1): only removes the last axis when its size is 1
    if d_output == 1:
        out = jnp.squeeze(out, -1)
    return out


# ----------------------------------------------------------------------------
# Pure-JAX reference (same bf16-weight / f32-accumulate / bf16-ReLU recipe)
# ----------------------------------------------------------------------------
def critic_reference(obs, action, params, weight_dtype=jnp.bfloat16):
    h = jnp.concatenate([obs, action], axis=-1).astype(weight_dtype)
    for i in range(1, 5):
        w = params[f"w{i}"].astype(weight_dtype)
        acc = jnp.dot(h, w, preferred_element_type=jnp.float32) + params[f"b{i}"]
        h = jnp.maximum(acc.astype(weight_dtype), 0)
    w5 = params["w5"].astype(weight_dtype)
    q = jnp.dot(h, w5, preferred_element_type=jnp.float32) + params["b5"]
    if q.shape[-1] == 1:
        q = jnp.squeeze(q, -1)
    return q


if __name__ == "__main__":
    key = jax.random.PRNGKey(0)
    k_obs, k_act, k_params = jax.random.split(key, 3)

    batch = 2
    obs_dim = 12
    act_dim = 4
    d_input = obs_dim + act_dim   # 16
    d_output = 1

    obs = jax.random.normal(k_obs, (batch, obs_dim), jnp.float32)
    action = jax.random.normal(k_act, (batch, act_dim), jnp.float32)
    params = init_critic_params(k_params, d_input, d_output)
    prep = prepare_critic_params(params)

    q = critic_forward(obs, action, prep)
    q = jax.block_until_ready(q)

    q_ref = critic_reference(obs, action, params)
    assert q.shape == (batch,), f"unexpected shape {q.shape}"
    assert jnp.allclose(q, q_ref, atol=1e-3, rtol=1e-3), \
        f"mismatch vs reference: {q} vs {q_ref}"

    print("KERNEL_OK")
</pallas_src>

<mosaic_0001>
module attributes {stable_mosaic.version = 11 : i64} {
  func.func @_critic_kernel(%arg0: i32, %arg1: memref<8x16xbf16, #tpu.memory_space<vmem>>, %arg2: memref<16x256xbf16, #tpu.memory_space<vmem>>, %arg3: memref<1x256xf32, #tpu.memory_space<vmem>>, %arg4: memref<256x256xbf16, #tpu.memory_space<vmem>>, %arg5: memref<1x256xf32, #tpu.memory_space<vmem>>, %arg6: memref<256x256xbf16, #tpu.memory_space<vmem>>, %arg7: memref<1x256xf32, #tpu.memory_space<vmem>>, %arg8: memref<256x256xbf16, #tpu.memory_space<vmem>>, %arg9: memref<1x256xf32, #tpu.memory_space<vmem>>, %arg10: memref<256x1xbf16, #tpu.memory_space<vmem>>, %arg11: memref<1x1xf32, #tpu.memory_space<vmem>>, %arg12: memref<8x1xf32, #tpu.memory_space<vmem>>) attributes {dimension_semantics = [#tpu.dimension_semantics<parallel>], iteration_bounds = array<i64: 1>, scalar_prefetch = 0 : i64, scratch_operands = 0 : i64, tpu.core_type = #tpu.core_type<tc>, window_params = [{transform_indices = @transform_0, window_bounds = array<i64: 8, 16>}, {pipeline_mode = #tpu.pipeline_mode<synchronous>, transform_indices = @transform_1, window_bounds = array<i64: 16, 256>}, {pipeline_mode = #tpu.pipeline_mode<synchronous>, transform_indices = @transform_2, window_bounds = array<i64: 1, 256>}, {pipeline_mode = #tpu.pipeline_mode<synchronous>, transform_indices = @transform_3, window_bounds = array<i64: 256, 256>}, {pipeline_mode = #tpu.pipeline_mode<synchronous>, transform_indices = @transform_4, window_bounds = array<i64: 1, 256>}, {pipeline_mode = #tpu.pipeline_mode<synchronous>, transform_indices = @transform_5, window_bounds = array<i64: 256, 256>}, {pipeline_mode = #tpu.pipeline_mode<synchronous>, transform_indices = @transform_6, window_bounds = array<i64: 1, 256>}, {pipeline_mode = #tpu.pipeline_mode<synchronous>, transform_indices = @transform_7, window_bounds = array<i64: 256, 256>}, {pipeline_mode = #tpu.pipeline_mode<synchronous>, transform_indices = @transform_8, window_bounds = array<i64: 1, 256>}, {pipeline_mode = #tpu.pipeline_mode<synchronous>, transform_indices = @transform_9, window_bounds = array<i64: 256, 1>}, {pipeline_mode = #tpu.pipeline_mode<synchronous>, transform_indices = @transform_10, window_bounds = array<i64: 1, 1>}, {transform_indices = @transform_11, window_bounds = array<i64: 8, 1>}]} {
    %c0 = arith.constant 0 : index
    %c0_0 = arith.constant 0 : index
    %0 = vector.load %arg1[%c0, %c0_0] : memref<8x16xbf16, #tpu.memory_space<vmem>>, vector<8x16xbf16>
    %c0_1 = arith.constant 0 : index
    %c0_2 = arith.constant 0 : index
    %1 = vector.load %arg2[%c0_1, %c0_2] : memref<16x256xbf16, #tpu.memory_space<vmem>>, vector<16x256xbf16>
    %cst = arith.constant dense<0.000000e+00> : vector<8x256xf32>
    %2 = tpu.matmul %0, %1, %cst {dimension_numbers = #tpu.dot_dimension_numbers<[1], [0], [0], [1], [0, 0, 1, 1], [], []>} : vector<8x16xbf16>, vector<16x256xbf16>, vector<8x256xf32> -> vector<8x256xf32>
    %c0_3 = arith.constant 0 : index
    %c0_4 = arith.constant 0 : index
    %3 = vector.load %arg3[%c0_3, %c0_4] : memref<1x256xf32, #tpu.memory_space<vmem>>, vector<1x256xf32>
    %4 = vector.broadcast %3 : vector<1x256xf32> to vector<8x256xf32>
    %5 = arith.addf %2, %4 : vector<8x256xf32>
    %6 = arith.truncf %5 : vector<8x256xf32> to vector<8x256xbf16>
    %cst_5 = arith.constant 0.000000e+00 : bf16
    %7 = vector.broadcast %cst_5 : bf16 to vector<8x256xbf16>
    %8 = arith.maximumf %6, %7 : vector<8x256xbf16>
    %c0_6 = arith.constant 0 : index
    %c0_7 = arith.constant 0 : index
    %9 = vector.load %arg4[%c0_6, %c0_7] : memref<256x256xbf16, #tpu.memory_space<vmem>>, vector<256x256xbf16>
    %cst_8 = arith.constant dense<0.000000e+00> : vector<8x256xf32>
    %10 = tpu.matmul %8, %9, %cst_8 {dimension_numbers = #tpu.dot_dimension_numbers<[1], [0], [0], [1], [0, 0, 1, 1], [], []>} : vector<8x256xbf16>, vector<256x256xbf16>, vector<8x256xf32> -> vector<8x256xf32>
    %c0_9 = arith.constant 0 : index
    %c0_10 = arith.constant 0 : index
    %11 = vector.load %arg5[%c0_9, %c0_10] : memref<1x256xf32, #tpu.memory_space<vmem>>, vector<1x256xf32>
    %12 = vector.broadcast %11 : vector<1x256xf32> to vector<8x256xf32>
    %13 = arith.addf %10, %12 : vector<8x256xf32>
    %14 = arith.truncf %13 : vector<8x256xf32> to vector<8x256xbf16>
    %cst_11 = arith.constant 0.000000e+00 : bf16
    %15 = vector.broadcast %cst_11 : bf16 to vector<8x256xbf16>
    %16 = arith.maximumf %14, %15 : vector<8x256xbf16>
    %c0_12 = arith.constant 0 : index
    %c0_13 = arith.constant 0 : index
    %17 = vector.load %arg6[%c0_12, %c0_13] : memref<256x256xbf16, #tpu.memory_space<vmem>>, vector<256x256xbf16>
    %cst_14 = arith.constant dense<0.000000e+00> : vector<8x256xf32>
    %18 = tpu.matmul %16, %17, %cst_14 {dimension_numbers = #tpu.dot_dimension_numbers<[1], [0], [0], [1], [0, 0, 1, 1], [], []>} : vector<8x256xbf16>, vector<256x256xbf16>, vector<8x256xf32> -> vector<8x256xf32>
    %c0_15 = arith.constant 0 : index
    %c0_16 = arith.constant 0 : index
    %19 = vector.load %arg7[%c0_15, %c0_16] : memref<1x256xf32, #tpu.memory_space<vmem>>, vector<1x256xf32>
    %20 = vector.broadcast %19 : vector<1x256xf32> to vector<8x256xf32>
    %21 = arith.addf %18, %20 : vector<8x256xf32>
    %22 = arith.truncf %21 : vector<8x256xf32> to vector<8x256xbf16>
    %cst_17 = arith.constant 0.000000e+00 : bf16
    %23 = vector.broadcast %cst_17 : bf16 to vector<8x256xbf16>
    %24 = arith.maximumf %22, %23 : vector<8x256xbf16>
    %c0_18 = arith.constant 0 : index
    %c0_19 = arith.constant 0 : index
    %25 = vector.load %arg8[%c0_18, %c0_19] : memref<256x256xbf16, #tpu.memory_space<vmem>>, vector<256x256xbf16>
    %cst_20 = arith.constant dense<0.000000e+00> : vector<8x256xf32>
    %26 = tpu.matmul %24, %25, %cst_20 {dimension_numbers = #tpu.dot_dimension_numbers<[1], [0], [0], [1], [0, 0, 1, 1], [], []>} : vector<8x256xbf16>, vector<256x256xbf16>, vector<8x256xf32> -> vector<8x256xf32>
    %c0_21 = arith.constant 0 : index
    %c0_22 = arith.constant 0 : index
    %27 = vector.load %arg9[%c0_21, %c0_22] : memref<1x256xf32, #tpu.memory_space<vmem>>, vector<1x256xf32>
    %28 = vector.broadcast %27 : vector<1x256xf32> to vector<8x256xf32>
    %29 = arith.addf %26, %28 : vector<8x256xf32>
    %30 = arith.truncf %29 : vector<8x256xf32> to vector<8x256xbf16>
    %cst_23 = arith.constant 0.000000e+00 : bf16
    %31 = vector.broadcast %cst_23 : bf16 to vector<8x256xbf16>
    %32 = arith.maximumf %30, %31 : vector<8x256xbf16>
    %c0_24 = arith.constant 0 : index
    %c0_25 = arith.constant 0 : index
    %33 = vector.load %arg10[%c0_24, %c0_25] : memref<256x1xbf16, #tpu.memory_space<vmem>>, vector<256x1xbf16>
    %cst_26 = arith.constant dense<0.000000e+00> : vector<8x1xf32>
    %34 = tpu.matmul %32, %33, %cst_26 {dimension_numbers = #tpu.dot_dimension_numbers<[1], [0], [0], [1], [0, 0, 1, 1], [], []>} : vector<8x256xbf16>, vector<256x1xbf16>, vector<8x1xf32> -> vector<8x1xf32>
    %c0_27 = arith.constant 0 : index
    %c0_28 = arith.constant 0 : index
    %35 = vector.load %arg11[%c0_27, %c0_28] : memref<1x1xf32, #tpu.memory_space<vmem>>, vector<1x1xf32>
    %36 = vector.broadcast %35 : vector<1x1xf32> to vector<8x1xf32>
    %37 = arith.addf %34, %36 : vector<8x1xf32>
    %c0_29 = arith.constant 0 : index
    %c0_30 = arith.constant 0 : index
    %38 = vector.load %arg12[%c0_29, %c0_30] : memref<8x1xf32, #tpu.memory_space<vmem>>, vector<8x1xf32>
    tpu.vector_store %arg12[%c0_29, %c0_30], %37 {strides = array<i32>} : memref<8x1xf32, #tpu.memory_space<vmem>>, vector<8x1xf32>,
    return
  }
  func.func @transform_0(%arg0: i32) -> (i32, i32) {
    %c0_i32 = arith.constant 0 : i32
    %c0_i32_0 = arith.constant 0 : i32
    return %arg0, %c0_i32 : i32, i32
  }
  func.func @transform_1(%arg0: i32) -> (i32, i32) {
    %c0_i32 = arith.constant 0 : i32
    %c0_i32_0 = arith.constant 0 : i32
    %c0_i32_1 = arith.constant 0 : i32
    return %c0_i32, %c0_i32_0 : i32, i32
  }
  func.func @transform_2(%arg0: i32) -> (i32, i32) {
    %c0_i32 = arith.constant 0 : i32
    %c0_i32_0 = arith.constant 0 : i32
    %c0_i32_1 = arith.constant 0 : i32
    return %c0_i32, %c0_i32_0 : i32, i32
  }
  func.func @transform_3(%arg0: i32) -> (i32, i32) {
    %c0_i32 = arith.constant 0 : i32
    %c0_i32_0 = arith.constant 0 : i32
    %c0_i32_1 = arith.constant 0 : i32
    return %c0_i32, %c0_i32_0 : i32, i32
  }
  func.func @transform_4(%arg0: i32) -> (i32, i32) {
    %c0_i32 = arith.constant 0 : i32
    %c0_i32_0 = arith.constant 0 : i32
    %c0_i32_1 = arith.constant 0 : i32
    return %c0_i32, %c0_i32_0 : i32, i32
  }
  func.func @transform_5(%arg0: i32) -> (i32, i32) {
    %c0_i32 = arith.constant 0 : i32
    %c0_i32_0 = arith.constant 0 : i32
    %c0_i32_1 = arith.constant 0 : i32
    return %c0_i32, %c0_i32_0 : i32, i32
  }
  func.func @transform_6(%arg0: i32) -> (i32, i32) {
    %c0_i32 = arith.constant 0 : i32
    %c0_i32_0 = arith.constant 0 : i32
    %c0_i32_1 = arith.constant 0 : i32
    return %c0_i32, %c0_i32_0 : i32, i32
  }
  func.func @transform_7(%arg0: i32) -> (i32, i32) {
    %c0_i32 = arith.constant 0 : i32
    %c0_i32_0 = arith.constant 0 : i32
    %c0_i32_1 = arith.constant 0 : i32
    return %c0_i32, %c0_i32_0 : i32, i32
  }
  func.func @transform_8(%arg0: i32) -> (i32, i32) {
    %c0_i32 = arith.constant 0 : i32
    %c0_i32_0 = arith.constant 0 : i32
    %c0_i32_1 = arith.constant 0 : i32
    return %c0_i32, %c0_i32_0 : i32, i32
  }
  func.func @transform_9(%arg0: i32) -> (i32, i32) {
    %c0_i32 = arith.constant 0 : i32
    %c0_i32_0 = arith.constant 0 : i32
    %c0_i32_1 = arith.constant 0 : i32
    return %c0_i32, %c0_i32_0 : i32, i32
  }
  func.func @transform_10(%arg0: i32) -> (i32, i32) {
    %c0_i32 = arith.constant 0 : i32
    %c0_i32_0 = arith.constant 0 : i32
    %c0_i32_1 = arith.constant 0 : i32
    return %c0_i32, %c0_i32_0 : i32, i32
  }
  func.func @transform_11(%arg0: i32) -> (i32, i32) {
    %c0_i32 = arith.constant 0 : i32
    %c0_i32_0 = arith.constant 0 : i32
    return %arg0, %c0_i32 : i32, i32
  }
}

</mosaic_0001>

<bundles_post_ra>
// kernel: tpu_custom_call.1
= control target key start
LH: loop header
LB: loop body
LE: loop exit
PB: predicated region body
PF: predicated region fallthrough
CT: control target
= control target key end

     0   :  { %s1677_s0 = inlined_call_operand.vmem [shape: bf16[8,16], index: 0, kind: input, shape index: {}]   ;;  %s1678_s1 = inlined_call_operand.vmem [shape: bf16[16,256], index: 1, kind: input, shape index: {}]   ;;  %s1679_s2 = inlined_call_operand.vmem [shape: f32[1,256], index: 2, kind: input, shape index: {}]   ;;  %s1680_s3 = inlined_call_operand.hbm [shape: bf16[256,256], index: 3, kind: input, shape index: {}]   ;;  %s1681_s4 = inlined_call_operand.vmem [shape: f32[1,256], index: 4, kind: input, shape index: {}]   ;;  %s1682_s5 = inlined_call_operand.hbm [shape: bf16[256,256], index: 5, kind: input, shape index: {}]   ;;  %s1683_s6 = inlined_call_operand.vmem [shape: f32[1,256], index: 6, kind: input, shape index: {}]   ;;  %s1684_s7 = inlined_call_operand.hbm [shape: bf16[256,256], index: 7, kind: input, shape index: {}]   ;;  %s1685_s8 = inlined_call_operand.vmem [shape: f32[1,256], index: 8, kind: input, shape index: {}]   ;;  %s1686_s9 = inlined_call_operand.vmem [shape: bf16[256,1], index: 9, kind: input, shape index: {}]   ;;  %s1687_s10 = inlined_call_operand.<no memory space> [shape: f32[1,1], index: 10, kind: input, shape index: {}]   ;;  %s1688_s11 = inlined_call_operand.vmem [shape: f32[8,1], index: 11, kind: output, shape index: {}]  }
   0x1   :  { %v16_v0 = vstv %s1687_s10 }
   0x2   :  { %17 = vst [vmem:[#allocation2] sm:$0x1] %v16_v0 }
   0x3   :  { %18 = vsyncpa [#allocation4], 0 }
   0x4   :  { %19 = vsyncpa [#allocation6], 0  ;;  %s1463_s19 = smov [#allocation5]   ;;  %s1464_s21 = smov [#allocation3]  }
   0x5   :  { %s45_s20 = sshll.u32 %s1463_s19, 4  ;;  %s31_s22 = sshll.u32 %s1464_s21, 4  ;;  %s46_s20 = int_to_ptr.vmem [resolvable:$true] %s45_s20  ;;  %s1532_s22 = int_to_ptr.vmem [resolvable:$true] %s31_s22 }
   0x6   :  { %s1393_s25 = scalar_lea.hbm %s1682_s5, 4096 }
   0x7   :  { %p1394_p0 = scmp.ne.s32.totalorder %s1682_s5, %s1393_s25  ;;  %p1397_p1 = scmp.lt.u32.totalorder %s1393_s25, %s1682_s5 }
   0x9   :  { %p1399_p2 = pnand %p1397_p1, %p1394_p0 }
   0xb   :  { %1402 = shalt.err (!%p1399_p2)
}
   0xc   :  { %s1403_s29 = scalar_lea.vmem %s46_s20, 4096  ;;  %p1408_p4 = scmp.lt.s32.totalorder %s46_s20, %s46_s20 }
   0xd   :  { %p1404_p3 = scmp.ne.s32.totalorder %s46_s20, %s1403_s29  ;;  %p1409_p5 = scmp.lt.s32.totalorder %s1403_s29, %s1403_s29 }
   0xf   :  { %p1410_p6 = por %p1409_p5, %p1408_p4 }
  0x11   :  { %p1411_p7 = pnand %p1410_p6, %p1404_p3 }
  0x13   :  { %1414 = shalt.err (!%p1411_p7)
}
  0x14   :  { %s1465_s30 = smov 128   ;;  %s1466_s12 = smov 8  }
  0x15   :  { %51 = dma.hbm_to_vmem [thread:$0]  %s1682_s5, 4096, %s46_s20, [#allocation6], %s1465_s30, %s1465_s30, %s1466_s12  }
  0x16   :  { %s1415_s17 = scalar_lea.hbm %s1680_s3, 4096 }
  0x17   :  { %p1416_p8 = scmp.ne.s32.totalorder %s1680_s3, %s1415_s17  ;;  %p1419_p9 = scmp.lt.u32.totalorder %s1415_s17, %s1680_s3 }
  0x19   :  { %p1421_p10 = pnand %p1419_p9, %p1416_p8 }
  0x1b   :  { %1424 = shalt.err (!%p1421_p10)
}
  0x1c   :  { %s1425_s24 = scalar_lea.vmem %s1532_s22, 4096  ;;  %p1430_p12 = scmp.lt.s32.totalorder %s1532_s22, %s1532_s22 }
  0x1d   :  { %p1426_p11 = scmp.ne.s32.totalorder %s1532_s22, %s1425_s24  ;;  %p1431_p13 = scmp.lt.s32.totalorder %s1425_s24, %s1425_s24 }
  0x1f   :  { %p1432_p0 = por %p1431_p13, %p1430_p12 }
  0x21   :  { %p1433_p1 = pnand %p1432_p0, %p1426_p11 }
  0x23   :  { %1436 = shalt.err (!%p1433_p1)
}
  0x24   :  { %37 = dma.hbm_to_vmem [thread:$0]  %s1680_s3, 4096, %s1532_s22, [#allocation4], %s1465_s30, %s1465_s30, %s1466_s12  }
  0x25   :  { %s1467_s25 = smov [#allocation7]   ;;  %s1437_s10 = scalar_lea.hbm %s1684_s7, 4096 }
  0x26   :  { %s59_s26 = sshll.u32 %s1467_s25, 4  ;;  %p1438_p2 = scmp.ne.s32.totalorder %s1684_s7, %s1437_s10  ;;  %s60_s26 = int_to_ptr.vmem [resolvable:$true] %s59_s26 }
  0x27   :  { %p1441_p3 = scmp.lt.u32.totalorder %s1437_s10, %s1684_s7 }
  0x29   :  { %p1443_p4 = pnand %p1441_p3, %p1438_p2 }
  0x2b   :  { %1446 = shalt.err (!%p1443_p4)
}
  0x2c   :  { %s1447_s16 = scalar_lea.vmem %s60_s26, 4096  ;;  %p1452_p6 = scmp.lt.s32.totalorder %s60_s26, %s60_s26 }
  0x2d   :  { %p1448_p5 = scmp.ne.s32.totalorder %s60_s26, %s1447_s16  ;;  %p1453_p7 = scmp.lt.s32.totalorder %s1447_s16, %s1447_s16 }
  0x2f   :  { %p1454_p8 = por %p1453_p7, %p1452_p6 }
  0x31   :  { %p1455_p9 = pnand %p1454_p8, %p1448_p5 }
  0x33   :  { %1458 = shalt.err (!%p1455_p9)
}
  0x34   :  { %65 = dma.hbm_to_vmem [thread:$0]  %s1684_s7, 4096, %s60_s26, [#allocation6], %s1465_s30, %s1465_s30, %s1466_s12  }
  0x35   :  { %1459 = dma.done.wait [#allocation4], 4096  }
  0x36   :  { %1460 = vsyncadd [#allocation4], 4294963200 }
  0x37   :  { %1461 = dma.done.wait [#allocation6], 8192  }
  0x38   :  { %1462 = vsyncadd [#allocation6], 4294959104  ;;  %v1468_v1 = vmov 0   ;;  %v1230_v2 = vld [vmem:[%s1678_s1 + $0x4] ss:$8 sps:$4 sm:$0xff]   ;;  %vm107_vm0 = vcmask 130048  }
  0x39   :  { %143 = vmatprep.mubr.bf16.mxu0 %v1468_v1  ;;  %v1232_v3 = vld [vmem:[%s1678_s1] ss:$8 sps:$4 sm:$0xff]   ;;  %111 = vmatprep.subr.bf16.mxu0 %v1230_v2  ;;  %v1238_v8 = vld [vmem:[#allocation3 + $0x10] ss:$8 sps:$4 sm:$0xff]   ;;  %v87_v2 = vlaneseq  ;;  %vm1078_vm1 = vcmask 7168  }
  0x3a   :  { %v82_v4 = vld [vmem:[%s1677_s0] sm:$0xf]  ;;  %v1233_v5 = vld [vmem:[#allocation3 + $0x4] ss:$8 sps:$4 sm:$0xff]   ;;  %112 = vmatpush1.bf16.msra.mxu0 %v1232_v3  ;;  %v1244_v12 = vld [vmem:[#allocation3 + $0x30] ss:$8 sps:$4 sm:$0xff]  }
  0x3b   :  { %v1235_v6 = vld [vmem:[#allocation3] ss:$8 sps:$4 sm:$0xff]   ;;  %v1236_v7 = vld [vmem:[#allocation3 + $0x14] ss:$8 sps:$4 sm:$0xff]   ;;  %360 = vmatprep.subr.bf16.mxu1 %v1233_v5  ;;  %v1239_v9 = vld [vmem:[#allocation3 + $0x24] ss:$8 sps:$4 sm:$0xff]  }
  0x3c   :  { %361 = vmatpush1.bf16.msra.mxu1 %v1235_v6  ;;  %v1241_v10 = vld [vmem:[#allocation3 + $0x20] ss:$8 sps:$4 sm:$0xff]   ;;  %v1242_v11 = vld [vmem:[#allocation3 + $0x34] ss:$8 sps:$4 sm:$0xff]   ;;  %v1245_v13 = vld [vmem:[#allocation3 + $0x44] ss:$8 sps:$4 sm:$0xff]  }
  0x3d   :  { %1088 = vmatmul.mubr.msk.bf16.vlgmr.msra.gmra.mrb[0].mxu0 %vm107_vm0, %v82_v4  ;;  %362 = vmatprep.subr.bf16.mxu1 %v1236_v7  ;;  %v1247_v14 = vld [vmem:[#allocation3 + $0x40] ss:$8 sps:$4 sm:$0xff]   ;;  %v1248_v15 = vld [vmem:[#allocation3 + $0x54] ss:$8 sps:$4 sm:$0xff]   ;;  %v1250_v16 = vld [vmem:[#allocation3 + $0x50] ss:$8 sps:$4 sm:$0xff]  }
  0x3e   :  { %v1251_v17 = vld [vmem:[#allocation3 + $0x64] ss:$8 sps:$4 sm:$0xff]   ;;  %v1253_v18 = vld [vmem:[#allocation3 + $0x60] ss:$8 sps:$4 sm:$0xff]   ;;  %v1254_v19 = vld [vmem:[#allocation3 + $0x74] ss:$8 sps:$4 sm:$0xff]  }
  0x3f   :  { %v1256_v20 = vld [vmem:[#allocation3 + $0x70] ss:$8 sps:$4 sm:$0xff]   ;;  %v1257_v21 = vld [vmem:[#allocation3 + $0x84] ss:$8 sps:$4 sm:$0xff]   ;;  %v1259_v22 = vld [vmem:[#allocation3 + $0x80] ss:$8 sps:$4 sm:$0xff]  }
  0x40   :  { %363 = vmatpush1.bf16.msra.mxu1 %v1238_v8  ;;  %v1260_v23 = vld [vmem:[#allocation3 + $0x94] ss:$8 sps:$4 sm:$0xff]   ;;  %v1262_v24 = vld [vmem:[#allocation3 + $0x90] ss:$8 sps:$4 sm:$0xff]   ;;  %v1263_v25 = vld [vmem:[#allocation3 + $0xa4] ss:$8 sps:$4 sm:$0xff]  }
  0x41   :  { %364 = vmatprep.subr.bf16.mxu1 %v1239_v9  ;;  %v1265_v26 = vld [vmem:[#allocation3 + $0xa0] ss:$8 sps:$4 sm:$0xff]   ;;  %v1266_v27 = vld [vmem:[#allocation3 + $0xb4] ss:$8 sps:$4 sm:$0xff]   ;;  %v1268_v28 = vld [vmem:[#allocation3 + $0xb0] ss:$8 sps:$4 sm:$0xff]  }
  0x42   :  { %v1269_v29 = vld [vmem:[#allocation3 + $0xc4] ss:$8 sps:$4 sm:$0xff]   ;;  %v1271_v30 = vld [vmem:[#allocation3 + $0xc0] ss:$8 sps:$4 sm:$0xff]   ;;  %v1272_v31 = vld [vmem:[#allocation3 + $0xd4] ss:$8 sps:$4 sm:$0xff]  }
  0x43   :  { %v1274_v32 = vld [vmem:[#allocation3 + $0xd0] ss:$8 sps:$4 sm:$0xff]   ;;  %v1275_v33 = vld [vmem:[#allocation3 + $0xe4] ss:$8 sps:$4 sm:$0xff]   ;;  %v1277_v34 = vld [vmem:[#allocation3 + $0xe0] ss:$8 sps:$4 sm:$0xff]  }
  0x44   :  { %365 = vmatpush1.bf16.msra.mxu1 %v1241_v10  ;;  %v1278_v35 = vld [vmem:[#allocation3 + $0xf4] ss:$8 sps:$4 sm:$0xff]   ;;  %v1280_v36 = vld [vmem:[#allocation3 + $0xf0] ss:$8 sps:$4 sm:$0xff]   ;;  %v1281_v37 = vld [vmem:[#allocation5] ss:$8 sps:$4 sm:$0xff]  }
  0x45   :  { %366 = vmatprep.subr.bf16.mxu1 %v1242_v11  ;;  %v1283_v38 = vld [vmem:[#allocation5 + $0x4] ss:$8 sps:$4 sm:$0xff]   ;;  %v1286_v39 = vld [vmem:[#allocation5 + $0x14] ss:$8 sps:$4 sm:$0xff]   ;;  %v1284_v40 = vld [vmem:[#allocation5 + $0x10] ss:$8 sps:$4 sm:$0xff]  }
  0x46   :  { %609 = vmatprep.subr.bf16.mxu0 %v1283_v38  ;;  %v1289_v41 = vld [vmem:[#allocation5 + $0x24] ss:$8 sps:$4 sm:$0xff]   ;;  %v1287_v42 = vld [vmem:[#allocation5 + $0x20] ss:$8 sps:$4 sm:$0xff]   ;;  %v1292_v43 = vld [vmem:[#allocation5 + $0x34] ss:$8 sps:$4 sm:$0xff]  }
  0x47   :  { %610 = vmatpush1.bf16.msra.mxu0 %v1281_v37  ;;  %v1290_v44 = vld [vmem:[#allocation5 + $0x30] ss:$8 sps:$4 sm:$0xff]   ;;  %v1295_v45 = vld [vmem:[#allocation5 + $0x44] ss:$8 sps:$4 sm:$0xff]   ;;  %v1293_v46 = vld [vmem:[#allocation5 + $0x40] ss:$8 sps:$4 sm:$0xff]  }
  0x48   :  { %367 = vmatpush1.bf16.msra.mxu1 %v1244_v12  ;;  %611 = vmatprep.subr.bf16.mxu0 %v1286_v39  ;;  %v1298_v47 = vld [vmem:[#allocation5 + $0x54] ss:$8 sps:$4 sm:$0xff]   ;;  %v1296_v48 = vld [vmem:[#allocation5 + $0x50] ss:$8 sps:$4 sm:$0xff]   ;;  %v1301_v49 = vld [vmem:[#allocation5 + $0x64] ss:$8 sps:$4 sm:$0xff]  }
  0x49   :  { %368 = vmatprep.subr.bf16.mxu1 %v1245_v13  ;;  %v1299_v50 = vld [vmem:[#allocation5 + $0x60] ss:$8 sps:$4 sm:$0xff]   ;;  %v1304_v51 = vld [vmem:[#allocation5 + $0x74] ss:$8 sps:$4 sm:$0xff]   ;;  %v1302_v52 = vld [vmem:[#allocation5 + $0x70] ss:$8 sps:$4 sm:$0xff]  }
  0x4a   :  { %v1307_v53 = vld [vmem:[#allocation5 + $0x84] ss:$8 sps:$4 sm:$0xff]   ;;  %v1305_v54 = vld [vmem:[#allocation5 + $0x80] ss:$8 sps:$4 sm:$0xff]   ;;  %v1310_v55 = vld [vmem:[#allocation5 + $0x94] ss:$8 sps:$4 sm:$0xff]  }
  0x4b   :  { %612 = vmatpush1.bf16.msra.mxu0 %v1284_v40  ;;  %v1308_v56 = vld [vmem:[#allocation5 + $0x90] ss:$8 sps:$4 sm:$0xff]   ;;  %v1313_v57 = vld [vmem:[#allocation5 + $0xa4] ss:$8 sps:$4 sm:$0xff]   ;;  %v1311_v58 = vld [vmem:[#allocation5 + $0xa0] ss:$8 sps:$4 sm:$0xff]  }
  0x4c   :  { %369 = vmatpush1.bf16.msra.mxu1 %v1247_v14  ;;  %613 = vmatprep.subr.bf16.mxu0 %v1289_v41  ;;  %v1316_v59 = vld [vmem:[#allocation5 + $0xb4] ss:$8 sps:$4 sm:$0xff]   ;;  %v1314_v60 = vld [vmem:[#allocation5 + $0xb0] ss:$8 sps:$4 sm:$0xff]   ;;  %v1319_v61 = vld [vmem:[#allocation5 + $0xc4] ss:$8 sps:$4 sm:$0xff]  }
  0x4d   :  { %370 = vmatprep.subr.bf16.mxu1 %v1248_v15  ;;  %v1317_v62 = vld [vmem:[#allocation5 + $0xc0] ss:$8 sps:$4 sm:$0xff]   ;;  %v1322_v63 = vld [vmem:[#allocation5 + $0xd4] ss:$8 sps:$4 sm:$0xff]   ;;  %v1320_v0 = vld [vmem:[#allocation5 + $0xd0] ss:$8 sps:$4 sm:$0xff]  }
  0x4e   :  { %v88_v3 = vshrl.u32 %v87_v2, 7  ;;  %v85_v5 = vld [vmem:[%s1679_s2] sm:$0x3]  ;;  %v1350_v38 = vld [vmem:[#allocation7 + $0x70] ss:$8 sps:$4 sm:$0xff]  }
  0x4f   :  { %614 = vmatpush1.bf16.msra.mxu0 %v1287_v42  ;;  %v1352_v37 = vld [vmem:[#allocation7 + $0x74] ss:$8 sps:$4 sm:$0xff]   ;;  %v1355_v39 = vld [vmem:[#allocation7 + $0x84] ss:$8 sps:$4 sm:$0xff]   ;;  %v1353_v40 = vld [vmem:[#allocation7 + $0x80] ss:$8 sps:$4 sm:$0xff]  }
  0x50   :  { %371 = vmatpush1.bf16.msra.mxu1 %v1250_v16  ;;  %615 = vmatprep.subr.bf16.mxu0 %v1292_v43  ;;  %v1594_v4 = vsub.s32 0, %v88_v3  ;;  %v1599_v6 = vsub.s32 1, %v88_v3  ;;  %v1358_v41 = vld [vmem:[#allocation7 + $0x94] ss:$8 sps:$4 sm:$0xff]   ;;  %v1356_v42 = vld [vmem:[#allocation7 + $0x90] ss:$8 sps:$4 sm:$0xff]  }
  0x51   :  { %372 = vmatprep.subr.bf16.mxu1 %v1251_v17  ;;  %v1361_v43 = vld [vmem:[#allocation7 + $0xa4] ss:$8 sps:$4 sm:$0xff]   ;;  %v1371_v2 = vld [vmem:[#allocation7 + $0xe0] ss:$8 sps:$4 sm:$0xff]   ;;  %v1376_v3 = vld [vmem:[#allocation7 + $0xf4] ss:$8 sps:$4 sm:$0xff]  }
  0x52   :  { %v90_v7 = vrot.slane %v85_v5, %v1594_v4  ;;  %v94_v8 = vrot.slane %v85_v5, %v1599_v6  ;;  %v1374_v5 = vld [vmem:[#allocation7 + $0xf0] ss:$8 sps:$4 sm:$0xff]  }
  0x53   :  { %616 = vmatpush1.bf16.msra.mxu0 %v1290_v44  ;;  %v1359_v44 = vld [vmem:[#allocation7 + $0xa0] ss:$8 sps:$4 sm:$0xff]  }
  0x54   :  { %373 = vmatpush1.bf16.msra.mxu1 %v1253_v18  ;;  %617 = vmatprep.subr.bf16.mxu0 %v1295_v45  ;;  %v1364_v45 = vld [vmem:[#allocation7 + $0xb4] ss:$8 sps:$4 sm:$0xff]  }
  0x55   :  { %374 = vmatprep.subr.bf16.mxu1 %v1254_v19  ;;  %v1325_v19 = vld [vmem:[#allocation5 + $0xe4] ss:$8 sps:$4 sm:$0xff]  }
  0x57   :  { %618 = vmatpush1.bf16.msra.mxu0 %v1293_v46  ;;  %v1362_v46 = vld [vmem:[#allocation7 + $0xb0] ss:$8 sps:$4 sm:$0xff]  }
  0x58   :  { %375 = vmatpush1.bf16.msra.mxu1 %v1256_v20  ;;  %619 = vmatprep.subr.bf16.mxu0 %v1298_v47  ;;  %v1323_v20 = vld [vmem:[#allocation5 + $0xe0] ss:$8 sps:$4 sm:$0xff]   ;;  %v1367_v47 = vld [vmem:[#allocation7 + $0xc4] ss:$8 sps:$4 sm:$0xff]  }
  0x59   :  { %376 = vmatprep.subr.bf16.mxu1 %v1257_v21  ;;  %v1328_v21 = vld [vmem:[#allocation5 + $0xf4] ss:$8 sps:$4 sm:$0xff]  }
  0x5b   :  { %620 = vmatpush1.bf16.msra.mxu0 %v1296_v48  ;;  %v1365_v48 = vld [vmem:[#allocation7 + $0xc0] ss:$8 sps:$4 sm:$0xff]  }
  0x5c   :  { %377 = vmatpush1.bf16.msra.mxu1 %v1259_v22  ;;  %621 = vmatprep.subr.bf16.mxu0 %v1301_v49  ;;  %v1326_v22 = vld [vmem:[#allocation5 + $0xf0] ss:$8 sps:$4 sm:$0xff]   ;;  %v1370_v49 = vld [vmem:[#allocation7 + $0xd4] ss:$8 sps:$4 sm:$0xff]  }
  0x5d   :  { %378 = vmatprep.subr.bf16.mxu1 %v1260_v23  ;;  %v1329_v23 = vld [vmem:[#allocation7] ss:$8 sps:$4 sm:$0xff]  }
  0x5f   :  { %622 = vmatpush1.bf16.msra.mxu0 %v1299_v50  ;;  %v1368_v50 = vld [vmem:[#allocation7 + $0xd0] ss:$8 sps:$4 sm:$0xff]  }
  0x60   :  { %379 = vmatpush1.bf16.msra.mxu1 %v1262_v24  ;;  %623 = vmatprep.subr.bf16.mxu0 %v1304_v51  ;;  %v1331_v24 = vld [vmem:[#allocation7 + $0x4] ss:$8 sps:$4 sm:$0xff]   ;;  %v188_v51 = vld [vmem:[%s1681_s4] sm:$0x3] }
  0x61   :  { %380 = vmatprep.subr.bf16.mxu1 %v1263_v25  ;;  %v1334_v25 = vld [vmem:[#allocation7 + $0x14] ss:$8 sps:$4 sm:$0xff]  }
  0x63   :  { %624 = vmatpush1.bf16.msra.mxu0 %v1302_v52  ;;  %v193_v52 = vrot.slane %v188_v51, %v1594_v4 }
  0x64   :  { %381 = vmatpush1.bf16.msra.mxu1 %v1265_v26  ;;  %625 = vmatprep.subr.bf16.mxu0 %v1307_v53  ;;  %v1332_v26 = vld [vmem:[#allocation7 + $0x10] ss:$8 sps:$4 sm:$0xff]   ;;  %v197_v53 = vrot.slane %v188_v51, %v1599_v6 }
  0x65   :  { %382 = vmatprep.subr.bf16.mxu1 %v1266_v27  ;;  %v1337_v27 = vld [vmem:[#allocation7 + $0x24] ss:$8 sps:$4 sm:$0xff]  }
  0x67   :  { %626 = vmatpush1.bf16.msra.mxu0 %v1305_v54 }
  0x68   :  { %383 = vmatpush1.bf16.msra.mxu1 %v1268_v28  ;;  %627 = vmatprep.subr.bf16.mxu0 %v1310_v55  ;;  %v1335_v28 = vld [vmem:[#allocation7 + $0x20] ss:$8 sps:$4 sm:$0xff]  }
  0x69   :  { %384 = vmatprep.subr.bf16.mxu1 %v1269_v29  ;;  %v1340_v29 = vld [vmem:[#allocation7 + $0x34] ss:$8 sps:$4 sm:$0xff]  }
  0x6b   :  { %628 = vmatpush1.bf16.msra.mxu0 %v1308_v56 }
  0x6c   :  { %385 = vmatpush1.bf16.msra.mxu1 %v1271_v30  ;;  %629 = vmatprep.subr.bf16.mxu0 %v1313_v57  ;;  %v1338_v30 = vld [vmem:[#allocation7 + $0x30] ss:$8 sps:$4 sm:$0xff]  }
  0x6d   :  { %386 = vmatprep.subr.bf16.mxu1 %v1272_v31  ;;  %v1343_v31 = vld [vmem:[#allocation7 + $0x44] ss:$8 sps:$4 sm:$0xff]  }
  0x6f   :  { %630 = vmatpush1.bf16.msra.mxu0 %v1311_v58 }
  0x70   :  { %387 = vmatpush1.bf16.msra.mxu1 %v1274_v32  ;;  %631 = vmatprep.subr.bf16.mxu0 %v1316_v59  ;;  %v1341_v32 = vld [vmem:[#allocation7 + $0x40] ss:$8 sps:$4 sm:$0xff]  }
  0x71   :  { %388 = vmatprep.subr.bf16.mxu1 %v1275_v33  ;;  %v1346_v33 = vld [vmem:[#allocation7 + $0x54] ss:$8 sps:$4 sm:$0xff]  }
  0x73   :  { %632 = vmatpush1.bf16.msra.mxu0 %v1314_v60 }
  0x74   :  { %389 = vmatpush1.bf16.msra.mxu1 %v1277_v34  ;;  %633 = vmatprep.subr.bf16.mxu0 %v1319_v61  ;;  %v1344_v34 = vld [vmem:[#allocation7 + $0x50] ss:$8 sps:$4 sm:$0xff]  }
  0x75   :  { %390 = vmatprep.subr.bf16.mxu1 %v1278_v35  ;;  %v1349_v35 = vld [vmem:[#allocation7 + $0x64] ss:$8 sps:$4 sm:$0xff]  }
  0x77   :  { %634 = vmatpush1.bf16.msra.mxu0 %v1317_v62 }
  0x78   :  { %391 = vmatpush1.bf16.msra.mxu1 %v1280_v36  ;;  %635 = vmatprep.subr.bf16.mxu0 %v1322_v63  ;;  %v1347_v36 = vld [vmem:[#allocation7 + $0x60] ss:$8 sps:$4 sm:$0xff]  }
  0x79   :  { %858 = vmatprep.subr.bf16.mxu1 %v1331_v24 }
  0x7b   :  { %636 = vmatpush1.bf16.msra.mxu0 %v1320_v0  ;;  %v1373_v0 = vld [vmem:[#allocation7 + $0xe4] ss:$8 sps:$4 sm:$0xff]  }
  0x7c   :  { %637 = vmatprep.subr.bf16.mxu0 %v1325_v19  ;;  %v437_v19 = vld [vmem:[%s1683_s6] sm:$0x3] }
  0x7f   :  { %638 = vmatpush1.bf16.msra.mxu0 %v1323_v20  ;;  %v442_v20 = vrot.slane %v437_v19, %v1594_v4 }
  0x80   :  { %639 = vmatprep.subr.bf16.mxu0 %v1328_v21  ;;  %v446_v21 = vrot.slane %v437_v19, %v1599_v6 }
  0x83   :  { %640 = vmatpush1.bf16.msra.mxu0 %v1326_v22 }
 0x110   :  { %v145_v9 = vpop.f32.mrb[0].mxu0 }
 0x111   :  { %v146_v10 = vadd.f32 %v145_v9, %v90_v7  ;;  %v147_v11 = vpop.f32.mrb[1].mxu0  ;;  %v1377_v7 = vld [vmem:[%s1686_s9 + $0x40] sm:$0xff]   ;;  %v1379_v9 = vld [vmem:[%s1686_s9 + $0x48] sm:$0xff]  }
 0x112   :  { %v148_v12 = vadd.f32 %v147_v11, %v94_v8  ;;  %v149_v13 = vpop.f32.mrb[2].mxu0  ;;  %v1378_v8 = vld [vmem:[%s1686_s9] sm:$0xff]   ;;  %1202 = vmatprep.subr.bf16.mxu0 %v1377_v7  ;;  %v1381_v11 = vld [vmem:[%s1686_s9 + $0x50] sm:$0xff]  }
 0x113   :  { %v152_v14 = vpack.c.bf16 %v146_v10, %v146_v10  ;;  %v150_v15 = vpop.f32.mrb[3].mxu0  ;;  %v1380_v10 = vld [vmem:[%s1686_s9 + $0x8] sm:$0xff]   ;;  %v1383_v13 = vld [vmem:[%s1686_s9 + $0x58] sm:$0xff]  }
 0x114   :  { %v153_v16 = vpack.c.bf16 %v148_v12, %v148_v12  ;;  %v1382_v12 = vld [vmem:[%s1686_s9 + $0x10] sm:$0xff]   ;;  %v1385_v15 = vld [vmem:[%s1686_s9 + $0x60] sm:$0xff]  }
 0x115   :  { %v154_v18 = vmax.bf16 %v1468_v1, %v152_v14  ;;  %v1384_v14 = vld [vmem:[%s1686_s9 + $0x18] sm:$0xff]  }
 0x116   :  { %v155_v17 = vmax.bf16 %v1468_v1, %v153_v16  ;;  %v1386_v16 = vld [vmem:[%s1686_s9 + $0x20] sm:$0xff]  }
 0x118   :  { %392 = vmatprep.mubr.bf16.mxu1 %v155_v17  ;;  %v1387_v17 = vld [vmem:[%s1686_s9 + $0x68] sm:$0xff]  }
 0x119   :  { %393 = vmatmul.mubr.bf16.vlgmr.msra.gmra.mrb[0].mxu1 %v154_v18  ;;  %v1388_v18 = vld [vmem:[%s1686_s9 + $0x28] sm:$0xff]  }
 0x11a   :  { %859 = vmatpush1.bf16.msra.mxu1 %v1329_v23 }
 0x11b   :  { %860 = vmatprep.subr.bf16.mxu1 %v1334_v25 }
 0x11e   :  { %861 = vmatpush1.bf16.msra.mxu1 %v1332_v26 }
 0x11f   :  { %862 = vmatprep.subr.bf16.mxu1 %v1337_v27 }
 0x122   :  { %863 = vmatpush1.bf16.msra.mxu1 %v1335_v28 }
 0x123   :  { %864 = vmatprep.subr.bf16.mxu1 %v1340_v29 }
 0x126   :  { %865 = vmatpush1.bf16.msra.mxu1 %v1338_v30 }
 0x127   :  { %866 = vmatprep.subr.bf16.mxu1 %v1343_v31 }
 0x12a   :  { %867 = vmatpush1.bf16.msra.mxu1 %v1341_v32  ;;  %v1389_v32 = vld [vmem:[%s1686_s9 + $0x70] sm:$0xff]  }
 0x12b   :  { %868 = vmatprep.subr.bf16.mxu1 %v1346_v33  ;;  %v1390_v33 = vld [vmem:[%s1686_s9 + $0x30] sm:$0xff]  }
 0x12e   :  { %869 = vmatpush1.bf16.msra.mxu1 %v1344_v34  ;;  %v1391_v34 = vld [vmem:[%s1686_s9 + $0x78] sm:$0xff]  }
 0x12f   :  { %870 = vmatprep.subr.bf16.mxu1 %v1349_v35  ;;  %v1392_v35 = vld [vmem:[%s1686_s9 + $0x38] sm:$0xff]  }
 0x132   :  { %871 = vmatpush1.bf16.msra.mxu1 %v1347_v36  ;;  %v686_v36 = vld [vmem:[%s1685_s8] sm:$0x3] }
 0x133   :  { %872 = vmatprep.subr.bf16.mxu1 %v1352_v37  ;;  %v691_v37 = vrot.slane %v686_v36, %v1594_v4 }
 0x136   :  { %873 = vmatpush1.bf16.msra.mxu1 %v1350_v38  ;;  %v695_v38 = vrot.slane %v686_v36, %v1599_v6 }
 0x137   :  { %874 = vmatprep.subr.bf16.mxu1 %v1355_v39 }
 0x13a   :  { %875 = vmatpush1.bf16.msra.mxu1 %v1353_v40 }
 0x13b   :  { %876 = vmatprep.subr.bf16.mxu1 %v1358_v41 }
 0x13e   :  { %877 = vmatpush1.bf16.msra.mxu1 %v1356_v42 }
 0x13f   :  { %878 = vmatprep.subr.bf16.mxu1 %v1361_v43 }
 0x142   :  { %879 = vmatpush1.bf16.msra.mxu1 %v1359_v44 }
 0x143   :  { %880 = vmatprep.subr.bf16.mxu1 %v1364_v45 }
 0x146   :  { %881 = vmatpush1.bf16.msra.mxu1 %v1362_v46 }
 0x147   :  { %882 = vmatprep.subr.bf16.mxu1 %v1367_v47 }
 0x14a   :  { %883 = vmatpush1.bf16.msra.mxu1 %v1365_v48 }
 0x14b   :  { %884 = vmatprep.subr.bf16.mxu1 %v1370_v49 }
 0x14e   :  { %885 = vmatpush1.bf16.msra.mxu1 %v1368_v50  ;;  %v1185_v50 = vld [vmem:[#allocation2] ss:$0 sm:$0xff] }
 0x14f   :  { %886 = vmatprep.subr.bf16.mxu1 %v1373_v0 }
 0x152   :  { %887 = vmatpush1.bf16.msra.mxu1 %v1371_v2 }
 0x153   :  { %888 = vmatprep.subr.bf16.mxu1 %v1376_v3 }
 0x156   :  { %889 = vmatpush1.bf16.msra.mxu1 %v1374_v5 }
 0x1ec   :  { %v394_v54 = vpop.f32.mrb[0].mxu1 }
 0x1ed   :  { %v395_v55 = vadd.f32 %v394_v54, %v193_v52  ;;  %v396_v56 = vpop.f32.mrb[1].mxu1 }
 0x1ee   :  { %v397_v57 = vadd.f32 %v396_v56, %v197_v53  ;;  %v398_v58 = vpop.f32.mrb[2].mxu1 }
 0x1ef   :  { %v401_v59 = vpack.c.bf16 %v395_v55, %v395_v55  ;;  %v399_v60 = vpop.f32.mrb[3].mxu1 }
 0x1f0   :  { %v402_v61 = vpack.c.bf16 %v397_v57, %v397_v57 }
 0x1f1   :  { %v403_v63 = vmax.bf16 %v1468_v1, %v401_v59 }
 0x1f2   :  { %v404_v62 = vmax.bf16 %v1468_v1, %v402_v61 }
 0x1f4   :  { %641 = vmatprep.mubr.bf16.mxu0 %v404_v62 }
 0x1f5   :  { %642 = vmatmul.mubr.bf16.vlgmr.msra.gmra.mrb[4].mxu0 %v403_v63 }
 0x1f6   :  { %1203 = vmatpush3.bf16.msra.mxu0 %v1378_v8 }
 0x1f7   :  { %1204 = vmatprep.subr.bf16.mxu0 %v1379_v9 }
 0x1fa   :  { %1205 = vmatpush3.bf16.msra.mxu0 %v1380_v10 }
 0x1fb   :  { %1206 = vmatprep.subr.bf16.mxu0 %v1381_v11 }
 0x1fe   :  { %1207 = vmatpush3.bf16.msra.mxu0 %v1382_v12 }
 0x1ff   :  { %1208 = vmatprep.subr.bf16.mxu0 %v1383_v13 }
 0x202   :  { %1209 = vmatpush3.bf16.msra.mxu0 %v1384_v14 }
 0x203   :  { %1210 = vmatprep.subr.bf16.mxu0 %v1385_v15 }
 0x206   :  { %1211 = vmatpush3.bf16.msra.mxu0 %v1386_v16 }
 0x207   :  { %1212 = vmatprep.subr.bf16.mxu0 %v1387_v17 }
 0x20a   :  { %1213 = vmatpush3.bf16.msra.mxu0 %v1388_v18 }
 0x20b   :  { %1214 = vmatprep.subr.bf16.mxu0 %v1389_v32 }
 0x20e   :  { %1215 = vmatpush3.bf16.msra.mxu0 %v1390_v33 }
 0x20f   :  { %1216 = vmatprep.subr.bf16.mxu0 %v1391_v34 }
 0x212   :  { %1217 = vmatpush3.bf16.msra.mxu0 %v1392_v35 }
 0x2c8   :  { %v643_v22 = vpop.f32.mrb[4].mxu0 }
 0x2c9   :  { %v644_v23 = vadd.f32 %v643_v22, %v442_v20  ;;  %v645_v24 = vpop.f32.mrb[5].mxu0 }
 0x2ca   :  { %v646_v25 = vadd.f32 %v645_v24, %v446_v21  ;;  %v647_v26 = vpop.f32.mrb[6].mxu0 }
 0x2cb   :  { %v650_v27 = vpack.c.bf16 %v644_v23, %v644_v23  ;;  %v648_v28 = vpop.f32.mrb[7].mxu0 }
 0x2cc   :  { %v651_v29 = vpack.c.bf16 %v646_v25, %v646_v25 }
 0x2cd   :  { %v652_v31 = vmax.bf16 %v1468_v1, %v650_v27 }
 0x2ce   :  { %v653_v30 = vmax.bf16 %v1468_v1, %v651_v29 }
 0x2d0   :  { %890 = vmatprep.mubr.bf16.mxu1 %v653_v30 }
 0x2d1   :  { %891 = vmatmul.mubr.bf16.vlgmr.msra.gmra.mrb[4].mxu1 %v652_v31 }
 0x3a4   :  { %v892_v39 = vpop.f32.mrb[4].mxu1 }
 0x3a5   :  { %v893_v40 = vadd.f32 %v892_v39, %v691_v37  ;;  %v894_v41 = vpop.f32.mrb[5].mxu1 }
 0x3a6   :  { %v895_v42 = vadd.f32 %v894_v41, %v695_v38  ;;  %v896_v43 = vpop.f32.mrb[6].mxu1 }
 0x3a7   :  { %v899_v44 = vpack.c.bf16 %v893_v40, %v893_v40  ;;  %v897_v45 = vpop.f32.mrb[7].mxu1 }
 0x3a8   :  { %v900_v46 = vpack.c.bf16 %v895_v42, %v895_v42 }
 0x3a9   :  { %v901_v48 = vmax.bf16 %v1468_v1, %v899_v44 }
 0x3aa   :  { %v902_v47 = vmax.bf16 %v1468_v1, %v900_v46 }
 0x3ac   :  { %1070 = vmatprep.mubr.bf16.mxu0 %v902_v47 }
 0x3ad   :  { %1071 = vmatmul.mubr.bf16.vlgmr.msra.gmra.mrb[8].mxu0 %v901_v48 }
 0x480   :  { %v1218_v49 = vpop.f32.mrb[8].mxu0 }
 0x481   :  { %v1219_v51 = vpop.f32.mrb[9].mxu0 }
 0x482   :  { %v1220_v4 = vadd.f32 %v1219_v51, %v1218_v49  ;;  %v1221_v52 = vpop.f32.mrb[10].mxu0 }
 0x483   :  { %v1222_v6 = vpop.f32.mrb[11].mxu0 }
 0x484   :  { %v1073_v53 = vadd.f32 %v1220_v4, %v1185_v50 }
 0x486   :  { %1079 = vst.msk [vmem:[%s1688_s11] sm:$0xff] %vm1078_vm1, %v1073_v53 }
 0x487   :  { %1084 = vsyncpa [#allocation4], 1 }
 0x488   :  { %1085 = vsyncpa [#allocation6], 1 }

</bundles_post_ra>
